<compile_context>
chip_gen: v6e
topology: v6e:2x2x1
jax: 0.10.0
libtpu: 0.0.40
codegen_flags: <defaults>
</compile_context>

<pallas_src>
import jax
import jax.numpy as jnp
from jax.experimental import pallas as pl
from jax.experimental.pallas import tpu as pltpu


def _round_up(x: int, m: int) -> int:
    return ((x + m - 1) // m) * m


def mlp_kernel(x_ref, w1_ref, b1_ref, w2_ref, b2_ref, o_ref):
    # In-kernel cast of the activation to the MXU input dtype (VPU op, hidden
    # under the activation DMA) -- avoids a separate XLA cast pass over x.
    x = x_ref[...].astype(w1_ref.dtype)
    # Linear 1 + ReLU: f32 accumulation on the MXU, f32 epilogue on the VPU.
    h = jnp.dot(x, w1_ref[...], preferred_element_type=jnp.float32)
    h = jnp.maximum(h + b1_ref[...], 0.0)                # (TB, H) + (1, H)
    # Linear 2 + Sigmoid.
    z = jnp.dot(h.astype(w2_ref.dtype), w2_ref[...],
                preferred_element_type=jnp.float32)
    o_ref[...] = jax.nn.sigmoid(z + b2_ref[...]).astype(o_ref.dtype)


@jax.jit
def torch_model_forward(x, w1, b1, w2, b2):
    """x: (B, n_input) f32; w1: (n_input, n_hidden); b1: (1, n_hidden) f32;
    w2: (n_hidden, n_out); b2: (1, n_out) f32. Returns (B, n_out) f32.

    Weights are stored pre-transposed vs. PyTorch ((in, out) instead of
    (out, in)) and pre-cast to the MXU compute dtype by prepare_params().
    bf16 weights are fine on v5e/v6e/v7x (f32 accumulation + f32 epilogue).
    """
    B, n_in = x.shape
    n_hidden = w1.shape[1]
    n_out = w2.shape[1]
    compute_dtype = w1.dtype
    x_bytes = jnp.dtype(x.dtype).itemsize
    w_bytes = jnp.dtype(compute_dtype).itemsize

    # Biases: (1, n) f32 rows for VPU broadcast (no-op if prepare_params ran).
    b1 = jnp.reshape(b1, (1, n_hidden)).astype(jnp.float32)
    b2 = jnp.reshape(b2, (1, n_out)).astype(jnp.float32)

    # --- Batch tile from an explicit VMEM budget (safe on v5e/v6e/v7x). ---
    sublane = 16 if compute_dtype == jnp.bfloat16 else 8
    # Resident operands (BlockSpec double-buffers even constant-index blocks).
    resident = 2 * ((n_in * n_hidden + n_hidden * n_out) * w_bytes
                    + (n_hidden + n_out) * 4)
    # Per batch-row: x (2 bufs) + out f32 (2 bufs) + f32 hidden intermediate.
    per_row = 2 * n_in * x_bytes + 2 * n_out * 4 + n_hidden * 4
    budget = 32 * 1024 * 1024
    tb_cap = max(sublane, ((budget - resident) // per_row) // sublane * sublane)

    if B <= sublane:
        TB = B                                         # single full-batch tile
    else:
        # >= 2 grid steps so "parallel" can shard across both v7x TensorCores.
        TB = max(sublane, min(512, _round_up(pl.cdiv(B, 2), sublane), tb_cap))
    grid = (pl.cdiv(B, TB),)                           # partial last tile OK

    footprint = resident + TB * per_row
    vmem_limit = int(min(64 * 1024 * 1024,
                         max(32 * 1024 * 1024, footprint * 3 // 2)))

    cost = pl.CostEstimate(
        flops=2 * B * (n_in * n_hidden + n_hidden * n_out),
        transcendentals=B * n_out,                     # sigmoid exp per output
        bytes_accessed=(B * n_in * x_bytes
                        + (n_in * n_hidden + n_hidden * n_out) * w_bytes
                        + (n_hidden + n_out) * 4
                        + B * n_out * 4),
    )

    return pl.pallas_call(
        mlp_kernel,
        out_shape=jax.ShapeDtypeStruct((B, n_out), jnp.float32),
        grid=grid,
        in_specs=[
            pl.BlockSpec((TB, n_in), lambda i: (i, 0)),        # x: batch-tiled
            pl.BlockSpec((n_in, n_hidden), lambda i: (0, 0)),  # w1: resident
            pl.BlockSpec((1, n_hidden), lambda i: (0, 0)),     # b1: resident
            pl.BlockSpec((n_hidden, n_out), lambda i: (0, 0)), # w2: resident
            pl.BlockSpec((1, n_out), lambda i: (0, 0)),        # b2: resident
        ],
        out_specs=pl.BlockSpec((TB, n_out), lambda i: (i, 0)),
        compiler_params=pltpu.CompilerParams(
            dimension_semantics=("parallel",),
            vmem_limit_bytes=vmem_limit),
        cost_estimate=cost,
    )(x, w1, b1, w2, b2)


def prepare_params(w1, b1, w2, b2, *, compute_dtype=jnp.float32):
    """One-time parameter prep (keep OUT of the per-call jitted forward):
    cast weights to the MXU compute dtype and shape biases as (1, n) f32."""
    w1 = jnp.asarray(w1, compute_dtype)
    w2 = jnp.asarray(w2, compute_dtype)
    b1 = jnp.reshape(jnp.asarray(b1, jnp.float32), (1, -1))
    b2 = jnp.reshape(jnp.asarray(b2, jnp.float32), (1, -1))
    return w1, b1, w2, b2


def init_params(key, n_input, n_hidden, n_out, dtype=jnp.float32):
    """Deterministic init mimicking torch.nn.Linear default (Kaiming-uniform-ish)."""
    k1, k2, k3, k4 = jax.random.split(key, 4)
    bound1 = 1.0 / (n_input ** 0.5)
    bound2 = 1.0 / (n_hidden ** 0.5)
    # Stored as (in, out) = transpose of PyTorch's (out, in) weight layout.
    w1 = jax.random.uniform(k1, (n_input, n_hidden), dtype, -bound1, bound1)
    b1 = jax.random.uniform(k2, (1, n_hidden), dtype, -bound1, bound1)
    w2 = jax.random.uniform(k3, (n_hidden, n_out), dtype, -bound2, bound2)
    b2 = jax.random.uniform(k4, (1, n_out), dtype, -bound2, bound2)
    return w1, b1, w2, b2


if __name__ == "__main__":
    key = jax.random.PRNGKey(0)
    batch, n_input, n_hidden, n_out = 8, 32, 32, 8

    kx, kp = jax.random.split(key)
    x = jax.random.normal(kx, (batch, n_input), dtype=jnp.float32)
    w1, b1, w2, b2 = init_params(kp, n_input, n_hidden, n_out)

    # f32 MXU path: exact vs. pure-JAX reference.
    params_f32 = prepare_params(w1, b1, w2, b2, compute_dtype=jnp.float32)
    out = jax.block_until_ready(torch_model_forward(x, *params_f32))
    ref = jax.nn.sigmoid(jnp.maximum(x @ w1 + b1, 0.0) @ w2 + b2)
    assert out.shape == (batch, n_out)
    assert jnp.allclose(out, ref, atol=1e-5, rtol=1e-5)

    # Ragged batch: exercises the cdiv partial-tile path (no pad/slice passes).
    x13 = jax.random.normal(kx, (13, n_input), dtype=jnp.float32)
    out13 = jax.block_until_ready(torch_model_forward(x13, *params_f32))
    ref13 = jax.nn.sigmoid(jnp.maximum(x13 @ w1 + b1, 0.0) @ w2 + b2)
    assert out13.shape == (13, n_out)
    assert jnp.allclose(out13, ref13, atol=1e-5, rtol=1e-5)

    # bf16 MXU path (valid on v5e/v6e/v7x: f32 accumulation + f32 epilogue).
    params_bf16 = prepare_params(w1, b1, w2, b2, compute_dtype=jnp.bfloat16)
    out_bf16 = jax.block_until_ready(torch_model_forward(x, *params_bf16))
    assert jnp.allclose(out_bf16, ref, atol=2e-2, rtol=2e-2)

    print("KERNEL_OK")
</pallas_src>

<mosaic_0001>
module attributes {stable_mosaic.version = 11 : i64} {
  func.func @mlp_kernel(%arg0: i32, %arg1: memref<8x32xf32, #tpu.memory_space<vmem>>, %arg2: memref<32x32xf32, #tpu.memory_space<vmem>>, %arg3: memref<1x32xf32, #tpu.memory_space<vmem>>, %arg4: memref<32x8xf32, #tpu.memory_space<vmem>>, %arg5: memref<1x8xf32, #tpu.memory_space<vmem>>, %arg6: memref<8x8xf32, #tpu.memory_space<vmem>>) attributes {dimension_semantics = [#tpu.dimension_semantics<parallel>], iteration_bounds = array<i64: 1>, scalar_prefetch = 0 : i64, scratch_operands = 0 : i64, tpu.core_type = #tpu.core_type<tc>, window_params = [{transform_indices = @transform_0, window_bounds = array<i64: 8, 32>}, {pipeline_mode = #tpu.pipeline_mode<synchronous>, transform_indices = @transform_1, window_bounds = array<i64: 32, 32>}, {pipeline_mode = #tpu.pipeline_mode<synchronous>, transform_indices = @transform_2, window_bounds = array<i64: 1, 32>}, {pipeline_mode = #tpu.pipeline_mode<synchronous>, transform_indices = @transform_3, window_bounds = array<i64: 32, 8>}, {pipeline_mode = #tpu.pipeline_mode<synchronous>, transform_indices = @transform_4, window_bounds = array<i64: 1, 8>}, {transform_indices = @transform_5, window_bounds = array<i64: 8, 8>}]} {
    %c0 = arith.constant 0 : index
    %c0_0 = arith.constant 0 : index
    %0 = vector.load %arg1[%c0, %c0_0] : memref<8x32xf32, #tpu.memory_space<vmem>>, vector<8x32xf32>
    %c0_1 = arith.constant 0 : index
    %c0_2 = arith.constant 0 : index
    %1 = vector.load %arg2[%c0_1, %c0_2] : memref<32x32xf32, #tpu.memory_space<vmem>>, vector<32x32xf32>
    %cst = arith.constant dense<0.000000e+00> : vector<8x32xf32>
    %2 = tpu.matmul %0, %1, %cst {dimension_numbers = #tpu.dot_dimension_numbers<[1], [0], [0], [1], [0, 0, 1, 1], [], []>} : vector<8x32xf32>, vector<32x32xf32>, vector<8x32xf32> -> vector<8x32xf32>
    %c0_3 = arith.constant 0 : index
    %c0_4 = arith.constant 0 : index
    %3 = vector.load %arg3[%c0_3, %c0_4] : memref<1x32xf32, #tpu.memory_space<vmem>>, vector<1x32xf32>
    %4 = vector.broadcast %3 : vector<1x32xf32> to vector<8x32xf32>
    %5 = arith.addf %2, %4 : vector<8x32xf32>
    %cst_5 = arith.constant 0.000000e+00 : f32
    %6 = vector.broadcast %cst_5 : f32 to vector<8x32xf32>
    %7 = arith.maximumf %5, %6 : vector<8x32xf32>
    %c0_6 = arith.constant 0 : index
    %c0_7 = arith.constant 0 : index
    %8 = vector.load %arg4[%c0_6, %c0_7] : memref<32x8xf32, #tpu.memory_space<vmem>>, vector<32x8xf32>
    %cst_8 = arith.constant dense<0.000000e+00> : vector<8x8xf32>
    %9 = tpu.matmul %7, %8, %cst_8 {dimension_numbers = #tpu.dot_dimension_numbers<[1], [0], [0], [1], [0, 0, 1, 1], [], []>} : vector<8x32xf32>, vector<32x8xf32>, vector<8x8xf32> -> vector<8x8xf32>
    %c0_9 = arith.constant 0 : index
    %c0_10 = arith.constant 0 : index
    %10 = vector.load %arg5[%c0_9, %c0_10] : memref<1x8xf32, #tpu.memory_space<vmem>>, vector<1x8xf32>
    %11 = vector.broadcast %10 : vector<1x8xf32> to vector<8x8xf32>
    %12 = arith.addf %9, %11 : vector<8x8xf32>
    %13 = arith.negf %12 : vector<8x8xf32>
    %14 = math.exp %13 : vector<8x8xf32>
    %cst_11 = arith.constant 1.000000e+00 : f32
    %15 = vector.broadcast %cst_11 : f32 to vector<8x8xf32>
    %16 = arith.addf %15, %14 : vector<8x8xf32>
    %17 = arith.divf %15, %16 : vector<8x8xf32>
    %c0_12 = arith.constant 0 : index
    %c0_13 = arith.constant 0 : index
    %18 = vector.load %arg6[%c0_12, %c0_13] : memref<8x8xf32, #tpu.memory_space<vmem>>, vector<8x8xf32>
    tpu.vector_store %arg6[%c0_12, %c0_13], %17 {strides = array<i32>} : memref<8x8xf32, #tpu.memory_space<vmem>>, vector<8x8xf32>,
    return
  }
  func.func @transform_0(%arg0: i32) -> (i32, i32) {
    %c0_i32 = arith.constant 0 : i32
    %c0_i32_0 = arith.constant 0 : i32
    return %arg0, %c0_i32 : i32, i32
  }
  func.func @transform_1(%arg0: i32) -> (i32, i32) {
    %c0_i32 = arith.constant 0 : i32
    %c0_i32_0 = arith.constant 0 : i32
    %c0_i32_1 = arith.constant 0 : i32
    return %c0_i32, %c0_i32_0 : i32, i32
  }
  func.func @transform_2(%arg0: i32) -> (i32, i32) {
    %c0_i32 = arith.constant 0 : i32
    %c0_i32_0 = arith.constant 0 : i32
    %c0_i32_1 = arith.constant 0 : i32
    return %c0_i32, %c0_i32_0 : i32, i32
  }
  func.func @transform_3(%arg0: i32) -> (i32, i32) {
    %c0_i32 = arith.constant 0 : i32
    %c0_i32_0 = arith.constant 0 : i32
    %c0_i32_1 = arith.constant 0 : i32
    return %c0_i32, %c0_i32_0 : i32, i32
  }
  func.func @transform_4(%arg0: i32) -> (i32, i32) {
    %c0_i32 = arith.constant 0 : i32
    %c0_i32_0 = arith.constant 0 : i32
    %c0_i32_1 = arith.constant 0 : i32
    return %c0_i32, %c0_i32_0 : i32, i32
  }
  func.func @transform_5(%arg0: i32) -> (i32, i32) {
    %c0_i32 = arith.constant 0 : i32
    %c0_i32_0 = arith.constant 0 : i32
    return %arg0, %c0_i32 : i32, i32
  }
}

</mosaic_0001>

<bundles_post_ra>
// kernel: torch_model_forward.1
= control target key start
LH: loop header
LB: loop body
LE: loop exit
PB: predicated region body
PF: predicated region fallthrough
CT: control target
= control target key end

     0   :  { %v280_v1 = vmov 0.0   ;;  %vm281_vm0 = vmmov 0   ;;  %s351_s0 = inlined_call_operand.vmem [shape: f32[8,32], index: 0, kind: input, shape index: {}]   ;;  %s352_s1 = inlined_call_operand.vmem [shape: f32[32,32], index: 1, kind: input, shape index: {}]   ;;  %s353_s2 = inlined_call_operand.vmem [shape: f32[1,32], index: 2, kind: input, shape index: {}]   ;;  %s354_s3 = inlined_call_operand.vmem [shape: f32[32,8], index: 3, kind: input, shape index: {}]   ;;  %s355_s4 = inlined_call_operand.vmem [shape: f32[1,8], index: 4, kind: input, shape index: {}]   ;;  %s356_s5 = inlined_call_operand.hbm [shape: f32[8,8], index: 5, kind: output, shape index: {}]  }
   0x1   :  { %v25_v0 = vld [vmem:[%s352_s1 + $0x18] sm:$0xff]  ;;  %229 = vmatprep.subr.mxu0 %v280_v1  ;;  %v24_v2 = vld [vmem:[%s352_s1 + $0x10] sm:$0xff]  ;;  %237 = vmatprep.mubr.msk.f32.mxu0 %vm281_vm0, %v280_v1 }
   0x2   :  { %v111_v3 = vld [vmem:[%s354_s3 + $0x18] sm:$0xff]  ;;  %230 = vmatpush3.msra.mxu0 %v25_v0  ;;  %240 = vmatprep.subr.mxu1 %v280_v1 }
   0x3   :  { %10 = vsyncpa [#allocation3], 0  ;;  %231 = vmatprep.subr.mxu0 %v280_v1  ;;  %v23_v4 = vld [vmem:[%s352_s1 + $0x8] sm:$0xff]  ;;  %241 = vmatpush3.msra.mxu1 %v111_v3  ;;  %v22_v5 = vld [vmem:[%s352_s1] sm:$0xff]  ;;  %vm33_vm1 = vcmask 261120   ;;  %vm198_vm2 = vcmask 64512  }
   0x4   :  { %232 = vmatpush3.msra.mxu0 %v24_v2  ;;  %242 = vmatprep.subr.mxu1 %v280_v1  ;;  %v21_v6 = vld [vmem:[%s351_s0] sm:$0xff]  ;;  %v110_v7 = vld [vmem:[%s354_s3 + $0x10] sm:$0xff]  ;;  %v109_v8 = vld [vmem:[%s354_s3 + $0x8] sm:$0xff] }
   0x5   :  { %233 = vmatprep.subr.mxu0 %v280_v1  ;;  %248 = vmatprep.mubr.msk.f32.mxu1 %vm281_vm0, %v280_v1  ;;  %v108_v9 = vld [vmem:[%s354_s3] sm:$0xff]  ;;  %s282_s3 = smov [#allocation2]  }
   0x6   :  { %234 = vmatpush3.msra.mxu0 %v23_v4  ;;  %243 = vmatpush3.msra.mxu1 %v110_v7  ;;  %v214_v10 = vld [vmem:[%s353_s2] ss:$0 sm:$0xff]  ;;  %s206_s2 = sshll.u32 %s282_s3, 4  ;;  %s207_s2 = int_to_ptr.vmem [resolvable:$true] %s206_s2 }
   0x7   :  { %235 = vmatprep.subr.mxu0 %v280_v1  ;;  %244 = vmatprep.subr.mxu1 %v280_v1  ;;  %v216_v15 = vld [vmem:[%s355_s4] ss:$0 sm:$0xff]  ;;  %s258_s13 = scalar_lea.vmem %s207_s2, 128  ;;  %p263_p1 = scmp.lt.s32.totalorder %s207_s2, %s207_s2 }
   0x8   :  { %236 = vmatpush3.msra.mxu0 %v22_v5  ;;  %245 = vmatpush3.msra.mxu1 %v109_v8  ;;  %p259_p0 = scmp.ne.s32.totalorder %s207_s2, %s258_s13  ;;  %p264_p2 = scmp.lt.s32.totalorder %s258_s13, %s258_s13 }
   0x9   :  { %238 = vmatmul.mubr.msk.f32.vlgmr.msra.gmra.mxu0 %vm33_vm1, %v21_v6  ;;  %246 = vmatprep.subr.mxu1 %v280_v1 }
   0xa   :  { %247 = vmatpush3.msra.mxu1 %v108_v9  ;;  %p265_p3 = por %p264_p2, %p263_p1 }
   0xc   :  { %p266_p4 = pnand %p265_p3, %p259_p0 }
  0xc9   :  { %v103_v11 = vpop.f32.mrf.mxu0 }
  0xca   :  { %v104_v12 = vadd.f32 %v214_v10, %v103_v11 }
  0xcb   :  { %v239_v13 = vpop.f32.mrf.mxu0 }
  0xcc   :  { %v107_v14 = vmax.f32 %v104_v12, 0.0 }
  0xce   :  { %249 = vmatmul.mubr.msk.f32.vlgmr.msra.gmra.mxu1 %vm33_vm1, %v107_v14 }
 0x18e   :  { %v188_v16 = vpop.f32.mrf.mxu1 }
 0x18f   :  { %v189_v17 = vadd.f32 %v216_v15, %v188_v16 }
 0x190   :  { %v250_v18 = vpop.f32.mrf.mxu1 }
 0x191   :  { %v218_v19 = vmul.f32 -1.442695, %v189_v17 }
 0x193   :  { %254 = vpow2.f32 %v218_v19 }
 0x1a0   :  { %v255_v20 = vpop.eup %254 }
 0x1a1   :  { %v195_v21 = vadd.f32 1.0, %v255_v20 }
 0x1a3   :  { %256 = vrcp.f32 %v195_v21 }
 0x1b0   :  { %v257_v22 = vpop.eup %256 }
 0x1b1   :  { %199 = vst.msk [vmem:[#allocation2] sm:$0xff] %vm198_vm2, %v257_v22 }
 0x1b2   :  { %269 = shalt.err (!%p266_p4)
}
 0x1b3   :  { %209 = dma.vmem_to_hbm [thread:$0]  %s207_s2, 128, %s356_s5, [#allocation3]  }
 0x1b4   :  { %278 = dma.done.wait [#allocation3], 128  }
 0x1b5   :  { %279 = vsyncadd [#allocation3], 4294967168 }
 0x1b6   :  { %213 = vsyncpa [#allocation3], 1 }

</bundles_post_ra>
